<compile_context>
chip_gen: v5e
topology: v5e:2x2
jax: 0.10.0
libtpu: 0.0.40
codegen_flags: <defaults>
</compile_context>

<pallas_src>
import math
import functools

import jax
import jax.numpy as jnp
from jax.experimental import pallas as pl
from jax.experimental.pallas import tpu as pltpu


def _vmem_limit_bytes():
    """Physical VMEM minus ~16 MiB headroom (64 MiB/TC on v7x, 128 MiB on v5e/v6e)."""
    cap = 128 * 1024 * 1024
    try:
        info_cap = int(pltpu.get_tpu_info().vmem_capacity_bytes)
        if info_cap > 0:
            cap = info_cap
    except Exception:
        pass
    return max(cap - 16 * 1024 * 1024, (cap * 3) // 4)


# ----------------------------------------------------------------------------
# Stage 1: AvgPool1d + 1x1 conv + folded BatchNorm (eval) + Mish + pos-enc.
# ----------------------------------------------------------------------------
def embed_kernel(xds_ref, we_ref, bns_ref, bnb_ref, pe_ref, out_ref, *, pool):
    # xds_ref: (1, pool, S, Cin) f32  -- Cin on lanes (per review).
    xp = xds_ref[0, 0]
    for p in range(1, pool):                       # pool is tiny; static unroll
        xp = xp + xds_ref[0, p]
    xp = xp * (1.0 / pool)                         # AvgPool1d  -> (S, Cin)
    y = jnp.dot(xp.astype(jnp.bfloat16), we_ref[...],
                preferred_element_type=jnp.float32)          # 1x1 conv -> (S, E)
    y = y * bns_ref[...] + bnb_ref[...]            # BatchNorm1d (eval, folded)
    y = y * jnp.tanh(jnp.logaddexp(y, 0.0))        # Mish
    out_ref[0] = y + pe_ref[...]                   # sinusoidal positional encoding


# ----------------------------------------------------------------------------
# Stage 2: post-LN TransformerEncoder stack + point-wise projection.
# grid = (batch_tiles, num_layers); the (Bt*S, E) activation is resident in
# VMEM scratch across the whole layer axis; per-layer weights are streamed.
# ----------------------------------------------------------------------------
def encoder_stack_kernel(
    xe_ref,                                    # (Bt, S, E) f32  embedded input (read at l==0)
    wqkv_ref, bqkv_ref,                        # (1, E, 3E) bf16 / (1, 1, 3E) f32 (Q pre-scaled)
    wo_ref, bo_ref,                            # (1, E, E) bf16 / (1, 1, E) f32
    w1_ref, b1_ref,                            # (1, E, dff) bf16 / (1, 1, dff) f32
    w2_ref, b2_ref,                            # (1, dff, E) bf16 / (1, 1, E) f32
    g1_ref, be1_ref, g2_ref, be2_ref,          # (1, 1, E) f32 LayerNorm params
    pw_ref, pb_ref,                            # (E, C) bf16 / (1, C) f32 final projection
    out_ref,                                   # (Bt, S, C) f32
    act_ref, qkv_ref, attn_ref,                # scratch: (Bt*S,E) f32, (Bt,S,3E) bf16, (Bt,S,E) f32
    *, nheads, head_dim, dff_chunk, q_block, eps=1e-5):
    l = pl.program_id(1)
    n_layers = pl.num_programs(1)
    Bt, S, E = attn_ref.shape
    D = head_dim
    dff = w1_ref.shape[2]
    BS = Bt * S

    @pl.when(l == 0)
    def _load_embedded():
        act_ref[...] = xe_ref[...].reshape(BS, E)

    x = act_ref[...]                                   # (Bt*S, E) f32
    x_bf = x.astype(jnp.bfloat16)

    # ---- fused QKV projection: one (Bt*S, E) @ (E, 3E) GEMM (lane-dense 3E) ---
    # 1/sqrt(head_dim) was folded into the Q weights/bias by the wrapper.
    qkv = jnp.dot(x_bf, wqkv_ref[0], preferred_element_type=jnp.float32)
    qkv_ref[...] = (qkv + bqkv_ref[0]).astype(jnp.bfloat16).reshape(Bt, S, 3 * E)

    # ---- per-head scores / softmax / AV, q-blocked so only a (q_block, S)
    # f32 score tile is live at a time; head outputs concatenate into attn_ref.
    # TODO(synk): for very long S add online-softmax KV blocking and shard the
    # q-block/head axis across the second TensorCore (core_map) on v7x at batch=1.
    for h in range(nheads):
        k_h = qkv_ref[:, :, E + h * D: E + (h + 1) * D]          # (Bt, S, D) bf16
        v_h = qkv_ref[:, :, 2 * E + h * D: 2 * E + (h + 1) * D]  # (Bt, S, D) bf16
        for qb in range(S // q_block):
            q0 = qb * q_block
            q_b = qkv_ref[:, q0:q0 + q_block, h * D:(h + 1) * D]  # (Bt, QB, D) bf16
            s = jnp.einsum("bqd,bkd->bqk", q_b, k_h,
                           preferred_element_type=jnp.float32)
            s = s - jnp.max(s, axis=-1, keepdims=True)
            p = jnp.exp(s)
            p = p * pl.reciprocal(jnp.sum(p, axis=-1, keepdims=True), approx=True)
            a_b = jnp.einsum("bqk,bkd->bqd", p.astype(jnp.bfloat16), v_h,
                             preferred_element_type=jnp.float32)
            attn_ref[:, q0:q0 + q_block, h * D:(h + 1) * D] = a_b

    # ---- fused output projection: one (Bt*S, E) @ (E, E) GEMM ----------------
    attn = jnp.dot(attn_ref[...].reshape(BS, E).astype(jnp.bfloat16), wo_ref[0],
                   preferred_element_type=jnp.float32) + bo_ref[0]

    def layer_norm(z, g, b):
        mu = jnp.mean(z, axis=-1, keepdims=True)
        zc = z - mu
        var = jnp.mean(zc * zc, axis=-1, keepdims=True)
        return zc * jax.lax.rsqrt(var + eps) * g + b

    x1 = layer_norm(x + attn, g1_ref[0], be1_ref[0])
    x1_bf = x1.astype(jnp.bfloat16)

    # ---- FFN, chunked over dff to bound the (Bt*S, dff) intermediate ---------
    h2 = jnp.zeros((BS, E), jnp.float32)
    for c in range(dff // dff_chunk):
        c0 = c * dff_chunk
        h1c = jnp.dot(x1_bf, w1_ref[0, :, c0:c0 + dff_chunk],
                      preferred_element_type=jnp.float32) + b1_ref[0, :, c0:c0 + dff_chunk]
        h1c = jnp.maximum(h1c, 0.0)                 # relu
        h2 = h2 + jnp.dot(h1c.astype(jnp.bfloat16), w2_ref[0, c0:c0 + dff_chunk, :],
                          preferred_element_type=jnp.float32)
    x2 = layer_norm(x1 + h2 + b2_ref[0], g2_ref[0], be2_ref[0])
    act_ref[...] = x2

    # ---- last layer step: point-wise Conv1d projection (with bias) -----------
    @pl.when(l == n_layers - 1)
    def _proj():
        y = jnp.dot(x2.astype(jnp.bfloat16), pw_ref[...],
                    preferred_element_type=jnp.float32) + pb_ref[...]
        out_ref[...] = y.reshape(Bt, S, out_ref.shape[2])


# ----------------------------------------------------------------------------
# Wrapper
# ----------------------------------------------------------------------------
def asr_forward(x, params, *, pool, nheads, head_dim,
                batch_tile=None, dff_chunk=None, q_block=None):
    B, Cin, T = x.shape
    S = T // pool
    E = nheads * head_dim
    C = params["proj_w"].shape[1]
    L = params["wqkv"].shape[0]
    dff = params["w1"].shape[2]

    if batch_tile is None:
        batch_tile = 2 if B % 2 == 0 else 1
    assert B % batch_tile == 0
    if dff_chunk is None:
        dff_chunk = min(dff, 512)
    assert dff % dff_chunk == 0
    if q_block is None:
        q_block = 256 if (S > 512 and S % 256 == 0) else S
    assert S % q_block == 0

    vmem_limit = _vmem_limit_bytes()

    # --- stage 1: embed (keeps x / pe / conv / BN out of the stack's VMEM) ----
    x = x[:, :, :S * pool]                            # AvgPool1d floor behaviour
    x_ds = jnp.transpose(x.reshape(B, Cin, S, pool), (0, 3, 2, 1))  # (B,pool,S,Cin)

    embed = pl.pallas_call(
        functools.partial(embed_kernel, pool=pool),
        out_shape=jax.ShapeDtypeStruct((B, S, E), jnp.float32),
        grid=(B,),
        in_specs=[
            pl.BlockSpec((1, pool, S, Cin), lambda b: (b, 0, 0, 0)),
            pl.BlockSpec((Cin, E), lambda b: (0, 0)),
            pl.BlockSpec((1, E), lambda b: (0, 0)),
            pl.BlockSpec((1, E), lambda b: (0, 0)),
            pl.BlockSpec((S, E), lambda b: (0, 0)),
        ],
        out_specs=pl.BlockSpec((1, S, E), lambda b: (b, 0, 0)),
        compiler_params=pltpu.CompilerParams(
            dimension_semantics=("parallel",),
            vmem_limit_bytes=vmem_limit),
    )(x_ds, params["embed_w"], params["bn_scale"], params["bn_shift"], params["pe"])

    # --- stage 2: encoder stack + projection -----------------------------------
    Bt = batch_tile

    def per_batch(shape):
        return pl.BlockSpec((Bt,) + shape[1:],
                            lambda b, l: (b,) + (0,) * (len(shape) - 1))

    def per_layer(shape):
        return pl.BlockSpec((1,) + shape[1:],
                            lambda b, l: (l,) + (0,) * (len(shape) - 1))

    def shared(shape):
        return pl.BlockSpec(shape, lambda b, l: (0,) * len(shape))

    layer_keys = ["wqkv", "bqkv", "wo", "bo", "w1", "b1", "w2", "b2",
                  "g1", "be1", "g2", "be2"]
    layer_ws = [params[k] for k in layer_keys]

    inputs = [embed] + layer_ws + [params["proj_w"], params["proj_b"]]
    in_specs = ([per_batch(embed.shape)]
                + [per_layer(w.shape) for w in layer_ws]
                + [shared(params["proj_w"].shape), shared(params["proj_b"].shape)])

    kern = functools.partial(encoder_stack_kernel, nheads=nheads, head_dim=head_dim,
                             dff_chunk=dff_chunk, q_block=q_block)
    out = pl.pallas_call(
        kern,
        out_shape=jax.ShapeDtypeStruct((B, S, C), jnp.float32),
        grid=(B // Bt, L),
        in_specs=in_specs,
        out_specs=pl.BlockSpec((Bt, S, C), lambda b, l: (b, 0, 0)),
        scratch_shapes=[
            pltpu.VMEM((Bt * S, E), jnp.float32),       # resident activation
            pltpu.VMEM((Bt, S, 3 * E), jnp.bfloat16),   # fused QKV
            pltpu.VMEM((Bt, S, E), jnp.float32),        # concatenated head outputs
        ],
        compiler_params=pltpu.CompilerParams(
            dimension_semantics=("parallel", "arbitrary"),
            vmem_limit_bytes=vmem_limit),
    )(*inputs)
    # lane-dense kernel output (B, S, C) -> PyTorch layout (B, C, S)
    return jnp.transpose(out, (0, 2, 1))


# ----------------------------------------------------------------------------
# Deterministic parameter construction (synthetic, no checkpoint).
# Matmul weights stored bf16 in (in, out) layout; biases / BN / LN / pos-enc f32.
# QKV packed as (L, E, 3E) with 1/sqrt(head_dim) folded into the Q slice.
# ----------------------------------------------------------------------------
def init_params(key, cin, E, dff, num_layers, num_classes, S, nheads):
    D = E // nheads
    L = num_layers
    bf = jnp.bfloat16
    ks = jax.random.split(key, 20)

    def nrm(k, shape, s=0.05, dtype=jnp.float32):
        return (s * jax.random.normal(k, shape)).astype(dtype)

    embed_w = nrm(ks[0], (cin, E), 0.1, bf)            # Conv1d(cin, E, 1) weight^T, no bias
    bn_gamma = 1.0 + nrm(ks[1], (1, E), 0.1)
    bn_beta = nrm(ks[2], (1, E), 0.1)
    bn_mean = nrm(ks[3], (1, E), 0.1)
    bn_var = 1.0 + jnp.abs(nrm(ks[4], (1, E), 0.1))
    bn_scale = (bn_gamma / jnp.sqrt(bn_var + 1e-5)).astype(jnp.float32)  # eval fold
    bn_shift = (bn_beta - bn_mean * bn_scale).astype(jnp.float32)

    pos = jnp.arange(S, dtype=jnp.float32)[:, None]
    div = jnp.exp(jnp.arange(0, E, 2, dtype=jnp.float32) * (-math.log(10000.0) / E))
    pe = jnp.stack([jnp.sin(pos * div), jnp.cos(pos * div)], axis=-1).reshape(S, E)
    pe = pe.astype(jnp.float32)

    # fused QKV (in, out) layout with attention scale folded into the Q slice
    wqkv = nrm(ks[5], (L, E, 3 * E), 0.05)
    bqkv = nrm(ks[6], (L, 1, 3 * E), 0.02)
    qscale = jnp.concatenate([jnp.full((E,), 1.0 / math.sqrt(D), jnp.float32),
                              jnp.ones((2 * E,), jnp.float32)])
    wqkv = (wqkv * qscale).astype(bf)
    bqkv = (bqkv * qscale).astype(jnp.float32)

    return dict(
        embed_w=embed_w, bn_scale=bn_scale, bn_shift=bn_shift, pe=pe,
        wqkv=wqkv, bqkv=bqkv,
        wo=nrm(ks[7], (L, E, E), 0.05, bf), bo=nrm(ks[8], (L, 1, E), 0.02),
        w1=nrm(ks[9], (L, E, dff), 0.05, bf), b1=nrm(ks[10], (L, 1, dff), 0.02),
        w2=nrm(ks[11], (L, dff, E), 0.05, bf), b2=nrm(ks[12], (L, 1, E), 0.02),
        g1=jnp.ones((L, 1, E), jnp.float32), be1=jnp.zeros((L, 1, E), jnp.float32),
        g2=jnp.ones((L, 1, E), jnp.float32), be2=jnp.zeros((L, 1, E), jnp.float32),
        proj_w=nrm(ks[13], (E, num_classes), 0.1, bf),
        proj_b=nrm(ks[14], (1, num_classes), 0.02),
    )


# ----------------------------------------------------------------------------
if __name__ == "__main__":
    # Small config consistent with the module structure
    # (reference: input_features=80, dhead=768, dff=2048, nheads=8, layers=10,
    #  num_classes=128, pool=3 — scaled down for a quick synthetic run).
    B, CIN, T = 2, 16, 24
    POOL = 3
    E, NHEADS, DFF = 128, 4, 256
    NUM_LAYERS = 2
    NUM_CLASSES = 32
    HEAD_DIM = E // NHEADS
    S = T // POOL

    key = jax.random.PRNGKey(0)
    kx, kp = jax.random.split(key)
    x = jax.random.normal(kx, (B, CIN, T), jnp.float32)   # (batch, features, time)

    params = init_params(kp, CIN, E, DFF, NUM_LAYERS, NUM_CLASSES, S, NHEADS)

    out = asr_forward(x, params, pool=POOL, nheads=NHEADS, head_dim=HEAD_DIM,
                      batch_tile=2, dff_chunk=128)
    out = jax.block_until_ready(out)

    assert out.shape == (B, NUM_CLASSES, S), out.shape
    assert out.dtype == jnp.float32
    assert bool(jnp.all(jnp.isfinite(out)))
    print("KERNEL_OK")
</pallas_src>

<mosaic_0001>
module attributes {stable_mosaic.version = 11 : i64} {
  func.func @embed_kernel(%arg0: i32, %arg1: memref<1x3x8x16xf32, #tpu.memory_space<vmem>>, %arg2: memref<16x128xbf16, #tpu.memory_space<vmem>>, %arg3: memref<1x128xf32, #tpu.memory_space<vmem>>, %arg4: memref<1x128xf32, #tpu.memory_space<vmem>>, %arg5: memref<8x128xf32, #tpu.memory_space<vmem>>, %arg6: memref<1x8x128xf32, #tpu.memory_space<vmem>>) attributes {dimension_semantics = [#tpu.dimension_semantics<parallel>], iteration_bounds = array<i64: 2>, scalar_prefetch = 0 : i64, scratch_operands = 0 : i64, tpu.core_type = #tpu.core_type<tc>, window_params = [{transform_indices = @transform_0, window_bounds = array<i64: 1, 3, 8, 16>}, {pipeline_mode = #tpu.pipeline_mode<synchronous>, transform_indices = @transform_1, window_bounds = array<i64: 16, 128>}, {pipeline_mode = #tpu.pipeline_mode<synchronous>, transform_indices = @transform_2, window_bounds = array<i64: 1, 128>}, {pipeline_mode = #tpu.pipeline_mode<synchronous>, transform_indices = @transform_3, window_bounds = array<i64: 1, 128>}, {pipeline_mode = #tpu.pipeline_mode<synchronous>, transform_indices = @transform_4, window_bounds = array<i64: 8, 128>}, {transform_indices = @transform_5, window_bounds = array<i64: 1, 8, 128>}]} {
    %c0 = arith.constant 0 : index
    %c0_0 = arith.constant 0 : index
    %c0_1 = arith.constant 0 : index
    %c0_2 = arith.constant 0 : index
    %0 = vector.load %arg1[%c0, %c0_0, %c0_1, %c0_2] : memref<1x3x8x16xf32, #tpu.memory_space<vmem>>, vector<1x1x8x16xf32>
    %1 = vector.shape_cast %0 : vector<1x1x8x16xf32> to vector<8x16xf32>
    %c0_3 = arith.constant 0 : index
    %c1 = arith.constant 1 : index
    %c0_4 = arith.constant 0 : index
    %c0_5 = arith.constant 0 : index
    %2 = vector.load %arg1[%c0_3, %c1, %c0_4, %c0_5] : memref<1x3x8x16xf32, #tpu.memory_space<vmem>>, vector<1x1x8x16xf32>
    %3 = vector.shape_cast %2 : vector<1x1x8x16xf32> to vector<8x16xf32>
    %4 = arith.addf %1, %3 : vector<8x16xf32>
    %c0_6 = arith.constant 0 : index
    %c2 = arith.constant 2 : index
    %c0_7 = arith.constant 0 : index
    %c0_8 = arith.constant 0 : index
    %5 = vector.load %arg1[%c0_6, %c2, %c0_7, %c0_8] : memref<1x3x8x16xf32, #tpu.memory_space<vmem>>, vector<1x1x8x16xf32>
    %6 = vector.shape_cast %5 : vector<1x1x8x16xf32> to vector<8x16xf32>
    %7 = arith.addf %4, %6 : vector<8x16xf32>
    %cst = arith.constant 0.333333343 : f32
    %8 = vector.broadcast %cst : f32 to vector<8x16xf32>
    %9 = arith.mulf %7, %8 : vector<8x16xf32>
    %10 = arith.truncf %9 : vector<8x16xf32> to vector<8x16xbf16>
    %c0_9 = arith.constant 0 : index
    %c0_10 = arith.constant 0 : index
    %11 = vector.load %arg2[%c0_9, %c0_10] : memref<16x128xbf16, #tpu.memory_space<vmem>>, vector<16x128xbf16>
    %cst_11 = arith.constant dense<0.000000e+00> : vector<8x128xf32>
    %12 = tpu.matmul %10, %11, %cst_11 {dimension_numbers = #tpu.dot_dimension_numbers<[1], [0], [0], [1], [0, 0, 1, 1], [], []>} : vector<8x16xbf16>, vector<16x128xbf16>, vector<8x128xf32> -> vector<8x128xf32>
    %c0_12 = arith.constant 0 : index
    %c0_13 = arith.constant 0 : index
    %13 = vector.load %arg3[%c0_12, %c0_13] : memref<1x128xf32, #tpu.memory_space<vmem>>, vector<1x128xf32>
    %14 = vector.broadcast %13 : vector<1x128xf32> to vector<8x128xf32>
    %15 = arith.mulf %12, %14 : vector<8x128xf32>
    %c0_14 = arith.constant 0 : index
    %c0_15 = arith.constant 0 : index
    %16 = vector.load %arg4[%c0_14, %c0_15] : memref<1x128xf32, #tpu.memory_space<vmem>>, vector<1x128xf32>
    %17 = vector.broadcast %16 : vector<1x128xf32> to vector<8x128xf32>
    %18 = arith.addf %15, %17 : vector<8x128xf32>
    %cst_16 = arith.constant 0.000000e+00 : f32
    %19 = vector.broadcast %cst_16 : f32 to vector<8x128xf32>
    %20 = arith.maximumf %18, %19 : vector<8x128xf32>
    %21 = vector.broadcast %cst_16 : f32 to vector<8x128xf32>
    %22 = arith.subf %18, %21 : vector<8x128xf32>
    %23 = arith.cmpf one, %22, %22 : vector<8x128xf32>
    %24 = vector.broadcast %cst_16 : f32 to vector<8x128xf32>
    %25 = arith.addf %18, %24 : vector<8x128xf32>
    %26 = math.absf %22 : vector<8x128xf32>
    %cst_17 = arith.constant 0.000000e+00 : f32
    %27 = vector.broadcast %cst_17 : f32 to vector<8x128xf32>
    %28 = arith.subf %27, %26 : vector<8x128xf32>
    %29 = math.exp %28 : vector<8x128xf32>
    %30 = math.log1p %29 : vector<8x128xf32>
    %31 = arith.addf %20, %30 : vector<8x128xf32>
    %32 = arith.select %23, %25, %31 : vector<8x128xi1>, vector<8x128xf32>
    %33 = math.tanh %32 : vector<8x128xf32>
    %34 = arith.mulf %18, %33 : vector<8x128xf32>
    %c0_18 = arith.constant 0 : index
    %c0_19 = arith.constant 0 : index
    %35 = vector.load %arg5[%c0_18, %c0_19] : memref<8x128xf32, #tpu.memory_space<vmem>>, vector<8x128xf32>
    %36 = arith.addf %34, %35 : vector<8x128xf32>
    %c0_20 = arith.constant 0 : index
    %c0_21 = arith.constant 0 : index
    %c0_22 = arith.constant 0 : index
    %37 = vector.load %arg6[%c0_20, %c0_21, %c0_22] : memref<1x8x128xf32, #tpu.memory_space<vmem>>, vector<1x8x128xf32>
    %38 = vector.shape_cast %37 : vector<1x8x128xf32> to vector<8x128xf32>
    %39 = vector.shape_cast %36 : vector<8x128xf32> to vector<1x8x128xf32>
    tpu.vector_store %arg6[%c0_20, %c0_21, %c0_22], %39 {strides = array<i32>} : memref<1x8x128xf32, #tpu.memory_space<vmem>>, vector<1x8x128xf32>,
    return
  }
  func.func @transform_0(%arg0: i32) -> (i32, i32, i32, i32) {
    %c0_i32 = arith.constant 0 : i32
    %c0_i32_0 = arith.constant 0 : i32
    %c0_i32_1 = arith.constant 0 : i32
    %c0_i32_2 = arith.constant 0 : i32
    return %arg0, %c0_i32, %c0_i32_0, %c0_i32_1 : i32, i32, i32, i32
  }
  func.func @transform_1(%arg0: i32) -> (i32, i32) {
    %c0_i32 = arith.constant 0 : i32
    %c0_i32_0 = arith.constant 0 : i32
    %c0_i32_1 = arith.constant 0 : i32
    return %c0_i32, %c0_i32_0 : i32, i32
  }
  func.func @transform_2(%arg0: i32) -> (i32, i32) {
    %c0_i32 = arith.constant 0 : i32
    %c0_i32_0 = arith.constant 0 : i32
    %c0_i32_1 = arith.constant 0 : i32
    return %c0_i32, %c0_i32_0 : i32, i32
  }
  func.func @transform_3(%arg0: i32) -> (i32, i32) {
    %c0_i32 = arith.constant 0 : i32
    %c0_i32_0 = arith.constant 0 : i32
    %c0_i32_1 = arith.constant 0 : i32
    return %c0_i32, %c0_i32_0 : i32, i32
  }
  func.func @transform_4(%arg0: i32) -> (i32, i32) {
    %c0_i32 = arith.constant 0 : i32
    %c0_i32_0 = arith.constant 0 : i32
    %c0_i32_1 = arith.constant 0 : i32
    return %c0_i32, %c0_i32_0 : i32, i32
  }
  func.func @transform_5(%arg0: i32) -> (i32, i32, i32) {
    %c0_i32 = arith.constant 0 : i32
    %c0_i32_0 = arith.constant 0 : i32
    %c0_i32_1 = arith.constant 0 : i32
    return %arg0, %c0_i32, %c0_i32_0 : i32, i32, i32
  }
}

</mosaic_0001>

<bundles_post_ra>
// kernel: tpu_custom_call.1
= control target key start
LH: loop header
LB: loop body
LE: loop exit
PB: predicated region body
PF: predicated region fallthrough
CT: control target
= control target key end

     0   :  { %s899_s0 = inlined_call_operand.hbm [shape: f32[2,3,8,16], index: 0, kind: input, shape index: {}]   ;;  %s900_s1 = inlined_call_operand.hbm [shape: bf16[16,128], index: 1, kind: input, shape index: {}]   ;;  %s901_s2 = inlined_call_operand.vmem [shape: f32[1,128], index: 2, kind: input, shape index: {}]   ;;  %s902_s3 = inlined_call_operand.vmem [shape: f32[1,128], index: 3, kind: input, shape index: {}]   ;;  %s903_s4 = inlined_call_operand.hbm [shape: f32[8,128], index: 4, kind: input, shape index: {}]   ;;  %s904_s5 = inlined_call_operand.hbm [shape: f32[2,8,128], index: 5, kind: output, shape index: {}]  }
   0x1   :  { %905 = sst [smem:[#allocation12_spill]] %s900_s1 }
   0x2   :  { %10 = vsyncpa [#allocation3], 0 }
   0x3   :  { %12 = vsyncpa [#allocation3 + $0x1], 0 }
   0x4   :  { %13 = vsyncpa [#allocation6], 0 }
   0x5   :  { %14 = vsyncpa [#allocation4], 0 }
   0x6   :  { %16 = vsyncpa [#allocation4 + $0x1], 0  ;;  %s751_s18 = smov 0   ;;  %s753_s19 = smov 0  }
   0x7   :  { %s755_s20 = smov 0   ;;  %s757_s21 = smov 0  }
   0x8 LB: > { %s772_s22 = sadd.s32 4294967295, %s713_s21   ;;  %s449_s23 = sadd.s32 4294967294, %s713_s21   ;;  %s713_s21 = sphi %s757_s21, %s916_s21   ;;  %s709_s20 = sphi %s755_s20, %s915_s20   ;;  %s705_s19 = sphi %s753_s19, %s914_s19   ;;  %s701_s18 = sphi %s751_s18, %s913_s18  }
   0x9   : > { %p42_p0 = scmp.ne.s32.totalorder %s705_s19, %s701_s18  ;;  %p43_p1 = scmp.eq.s32.totalorder %s772_s22, 0 }
   0xa   : > { %p150_p2 = scmp.eq.s32.totalorder %s772_s22, 1  ;;  %p156_p3 = scmp.eq.s32.totalorder %s449_s23, 1 }
   0xb   : > { %p781_p4 = por %p43_p1, %p42_p0  ;;  %p450_p5 = scmp.ge.s32.totalorder %s713_s21, 1 }
   0xc   : > { %p786_p6 = por %p156_p3, %p42_p0  ;;  %p163_p7 = scmp.lt.s32.totalorder %s713_s21, 3 }
   0xd   : > { %s908_s1 = sld [smem:[#allocation12_spill]]  ;;  %s715_s30 = smov [#allocation5]  }
   0xe   : > { %p794_p8 = pnand %p450_p5, %p163_p7  ;;  %s176_s6 = sshll.u32 %s715_s30, 4  ;;  %s177_s6 = int_to_ptr.vmem [resolvable:$true] %s176_s6 }
   0xf   : > { %s195_s9 = sshll.u32 %s903_s4, 4  ;;  %s716_s10 = smov 64   ;;  %s196_s9 = int_to_ptr.hbm [resolvable:$true] %s195_s9 }
  0x10   : > { %p486_p9 = pneg %p794_p8  ;;  %s717_s11 = smov 4  }
  0x11   : > { %s718_s12 = smov [#allocation7]   ;;  %s807_s14 = sadd.s32 1, %s713_s21  }
  0x12   : > { %p487_p10 = pnand %p486_p9, %p43_p1  ;;  %s197_s13 = sshll.u32 %s718_s12, 4  ;;  %s198_s13 = int_to_ptr.vmem [resolvable:$true] %s197_s13 }
  0x13   : > { %s174_s28 = sshll.u32 %s908_s1, 4  ;;  %s29_s15 = sadd.s32 1, %s709_s20  ;;  %s175_s28 = int_to_ptr.hbm [resolvable:$true] %s174_s28 }
  0x14   : > { %489 = dma.hbm_to_vmem [thread:$0]  (!%p487_p10), %s175_s28, 128, %s177_s6, [#allocation6], %s716_s10, %s716_s10, %s717_s11  }
  0x15   : > { %492 = dma.hbm_to_vmem [thread:$0]  (!%p487_p10), %s196_s9, 128, %s198_s13, [#allocation6]  }
  0x16   : > { %s26_s16 = ssub.s32 %s713_s21, %s807_s14  ;;  %p36_p12 = scmp.ne.s32.totalorder %s709_s20, %s705_s19 }
  0x17   : > { %p27_p13 = scmp.eq.s32.totalorder %s26_s16, 0  ;;  %p37_p0 = scmp.eq.s32.totalorder %s713_s21, 0 }
  0x18   : > { %p817_p3 = por %p150_p2, %p36_p12  ;;  %p503_p5 = scmp.lt.s32.totalorder %s713_s21, 2 }
  0x19   : > { %s823_s23 = scalar_select %p27_p13, %s709_s20, %s29_s15  }
  0x1a   : > { %p38_p7 = por %p37_p0, %p36_p12  ;;  %s208_s26 = sand.u32 1, %s709_s20  }
  0x1b   : > { %s471_s27 = smul.u32 24, %s208_s26  ;;  %s209_s12 = scalar_lea.sflag [#allocation3], %s208_s26 }
  0x1c   : > { %s472_s28 = smul.u32 24, %s713_s21  ;;  %p827_p9 = pnand %p503_p5, %p38_p7 }
  0x1d   : > { %s212_s9 = scalar_lea.vmem [#allocation2], %s471_s27  ;;  %s620_s6 = scalar_lea.hbm %s899_s0, 48 }
  0x1e   : > { %s217_s8 = scalar_lea.hbm %s899_s0, %s472_s28  ;;  %s220_s10 = sshll.u32 %s212_s9, 4  ;;  %s221_s10 = int_to_ptr.vmem [resolvable:$true] %s220_s10 }
  0x1f   : > { %s218_s11 = sshll.u32 %s217_s8, 4  ;;  %p617_p10 = pneg %p827_p9  ;;  %s219_s11 = int_to_ptr.hbm [resolvable:$true] %s218_s11 }
  0x20   : > { %s613_s13 = sshra.s32 %s219_s11, 4  ;;  %s614_s13 = int_to_ptr.hbm [resolvable:$true] %s613_s13 }
  0x21   : > { %s615_s15 = scalar_lea.hbm %s614_s13, 24  ;;  %p621_p0 = scmp.lt.s32.totalorder %s614_s13, %s899_s0 }
  0x22   : > { %p616_p2 = scmp.ne.s32.totalorder %s614_s13, %s615_s15  ;;  %p622_p5 = scmp.lt.s32.totalorder %s620_s6, %s615_s15 }
  0x24   : > { %p618_p12 = pnand %p617_p10, %p616_p2  ;;  %p623_p7 = por %p622_p5, %p621_p0 }
  0x26   : > { %p619_p13 = pneg %p618_p12 }
  0x28   : > { %p624_p11 = pnand %p623_p7, %p619_p13 }
  0x2a   : > { %627 = shalt.err (!%p624_p11)
}
  0x2b   : > { %s719_s26 = smov 128   ;;  %s720_s27 = smov 8  }
  0x2c   : > { %496 = dma.hbm_to_vmem [thread:$0]  (!%p827_p9), %s219_s11, 384, %s221_s10, %s209_s12, %s719_s26, %s719_s26, %s720_s27  }
  0x2d   : > { %232 = sbr.rel (%p794_p8) target bundleno = 235 (0xeb), region = 40  ;;  %s847_s1 = sand.u32 (!%p794_p8), 1, %s705_s19  }
  0x2e   : > { %s473_s8 = smul.u32 (!%p794_p8), 24, %s847_s1  ;;  %s235_s9 = scalar_lea.sflag (!%p794_p8), [#allocation3], %s847_s1 }
  0x30   : > { %s238_s13 = scalar_lea.vmem (!%p794_p8), [#allocation2], %s473_s8 }
  0x32   : > { %688 = dma.done.wait (%p781_p4), %s235_s9, 384  }
  0x33   : > { %690 = vsyncadd (%p781_p4), %s235_s9, 4294966912 }
  0x34   : > { %692 = dma.done.wait (%p43_p1), [#allocation6], 256  }
  0x35   : > { %694 = vsyncadd (%p43_p1), [#allocation6], 4294967040  ;;  %v470_v0 = vld [vmem:[#allocation5] sm:$0xff]  ;;  %v277_v1 = vld [vmem:[%s238_s13] sm:$0xff]  ;;  %vm294_vm0 = vcmask 130048   ;;  %s458_s11 = sshll.u32 %s847_s1, 3 }
  0x36   : > { %v459_v2 = vld [vmem:[%s238_s13 + $0x8] sm:$0xff]  ;;  %v460_v4 = vld [vmem:[%s238_s13 + $0x10] sm:$0xff]  ;;  %305 = vmatpush.bf16.msra.mxu0 %v470_v0  ;;  %s467_s12 = sshll.u32 %s772_s22, 3  ;;  %v341_v30 = vld [vmem:[#allocation7] sm:$0xff]  ;;  %s275_s7 = scalar_lea.vmem [#allocation8], %s458_s11 }
  0x37   : > { %v280_v3 = vadd.f32 %v459_v2, %v277_v1  ;;  %v545_v8 = vld [vmem:[%s901_s2] ss:$0 sm:$0xff]  ;;  %s355_s6 = scalar_lea.hbm %s904_s5, %s467_s12  ;;  %s357_s28 = sshll.u32 %s275_s7, 4  ;;  %s358_s28 = int_to_ptr.vmem [resolvable:$true] %s357_s28 }
  0x38   : > { %v546_v9 = vld [vmem:[%s902_s3] ss:$0 sm:$0xff]  ;;  %s359_s26 = sshll.u32 %s355_s6, 4  ;;  %s345_s27 = scalar_lea.sflag [#allocation4], %s847_s1  ;;  %s360_s26 = int_to_ptr.hbm [resolvable:$true] %s359_s26 }
  0x39   : > { %v283_v5 = vadd.f32 %v460_v4, %v280_v3  ;;  %s657_s8 = sshra.s32 %s360_s26, 4  ;;  %s663_s29 = scalar_lea.hbm %s904_s5, 16  ;;  %s658_s8 = int_to_ptr.hbm [resolvable:$true] %s657_s8 }
  0x3a   : > { %s659_s9 = scalar_lea.hbm %s658_s8, 8  ;;  %p664_p11 = scmp.lt.s32.totalorder %s658_s8, %s904_s5 }
  0x3b   : > { %v284_v6 = vmul.f32 0.33333334, %v283_v5  ;;  %p660_p1 = scmp.ne.s32.totalorder %s658_s8, %s659_s9  ;;  %p665_p9 = scmp.lt.s32.totalorder %s663_s29, %s659_s9 }
  0x3d   : > { %v285_v7 = vpack.c.bf16 %v284_v6, %v284_v6  ;;  %p661_p4 = pnand %p660_p1, %p817_p3  ;;  %p666_p2 = por %p665_p9, %p664_p11 }
  0x3f   : > { %465 = vmatmul.msk.bf16.vlgmr.msra.gmra.mxu0 %vm294_vm0, %v285_v7  ;;  %p662_p8 = pneg %p661_p4 }
  0x41   : > { %p667_p10 = pnand %p666_p2, %p662_p8 }
  0xbc   : > { %v307_v10 = vpop.f32.mrf.mxu0 }
  0xbd   : > { %v315_v11 = vmul.f32 %v545_v8, %v307_v10 }
  0xbf   : > { %v320_v12 = vadd.f32 %v546_v9, %v315_v11 }
  0xc1   : > { %v324_v13 = vand.u32 2147483647, %v320_v12  ;;  %v321_v25 = vmax.f32 %v320_v12, 0.0  ;;  %vm322_vm2 = vcmp.ne.f32.partialorder %v320_v12, %v320_v12 }
  0xc3   : > { %v325_v14 = vsub.f32 0.0, %v324_v13 }
  0xc4   : > { %v309_v15 = vpop.f32.mrf.mxu0 }
  0xc5   : > { %v326_v16 = vmul.f32 1.442695, %v325_v14 }
  0xc7   : > { %547 = vpow2.f32 %v326_v16 }
  0xcd   : > { %v548_v17 = vpop.eup %547 }
  0xce   : > { %v328_v18 = vadd.f32 1.0, %v548_v17  ;;  %v331_v19 = vmul.f32 -0.5, %v548_v17  ;;  %v334_v21 = vand.u32 2147483647, %v548_v17 }
  0xd0   : > { %549 = vlog2.f32 %v328_v18  ;;  %v332_v20 = vadd.f32 1.0, %v331_v19  ;;  %vm335_vm1 = vcmp.lt.f32.partialorder %v334_v21, 0.0004427343 }
  0xd2   : > { %v333_v24 = vmul.f32 %v548_v17, %v332_v20 }
  0xd6   : > { %v550_v22 = vpop.eup %549 }
  0xd7   : > { %v330_v23 = vmul.f32 0.6931472, %v550_v22 }
  0xd9   : > { %v336_v26 = vsel %vm335_vm1, %v333_v24, %v330_v23 }
  0xda   : > { %v337_v27 = vadd.f32 %v336_v26, %v321_v25 }
  0xdc   : > { %v338_v28 = vsel %vm322_vm2, %v320_v12, %v337_v27 }
  0xdd   : > { %551 = vtanh.f32 %v338_v28 }
  0xe3   : > { %v552_v29 = vpop.eup %551 }
  0xe4   : > { %v340_v31 = vmul.f32 %v552_v29, %v320_v12 }
  0xe6   : > { %v342_v32 = vadd.f32 %v341_v30, %v340_v31 }
  0xe8   : > { %343 = vst [vmem:[%s275_s7] sm:$0xff] %v342_v32 }
  0xe9   : > { %670 = shalt.err (!%p667_p10)
}
  0xea   : > { %484 = dma.vmem_to_hbm [thread:$0]  (%p817_p3), %s358_s28, 128, %s360_s26, %s345_s27  }
  0xeb PF: > { %s371_s1 = sand.u32 1, %s701_s18   ;;  %p912_p12 = scmp.ge.s32.totalorder %s713_s21, 2 }
  0xec   : > { %s372_s10 = scalar_lea.sflag [#allocation4], %s371_s1 }
  0xed   : > { %p498_p13 = pnand %p912_p12, %p786_p6 }
  0xef   : > { %p499_p0 = pneg %p498_p13 }
  0xf1   : > { %696 = dma.done.wait (%p499_p0), %s372_s10, 128  }
  0xf2   : > { %698 = vsyncadd (%p499_p0), %s372_s10, 4294967168  ;;  %p19_p5 = scmp.ge.s32.totalorder %s807_s14, 4   ;;  %s913_s18 = smov %s705_s19 }
  0xf3   : > { %s914_s19 = smov %s709_s20  ;;  %s915_s20 = smov %s823_s23 }
  0xf4   : > { %s916_s21 = smov %s807_s14  ;;  %21 = sbr.rel (!%p19_p5) target bundleno = 8 (0x8), region = 95 }
  0xf9   :  { %378 = vsyncpa [#allocation3], 1 }
  0xfa   :  { %380 = vsyncpa [#allocation3 + $0x1], 1 }
  0xfb   :  { %381 = vsyncpa [#allocation6], 1 }
  0xfc   :  { %382 = vsyncpa [#allocation4], 1 }
  0xfd   :  { %384 = vsyncpa [#allocation4 + $0x1], 1 }

</bundles_post_ra>
